<compile_context>
chip_gen: v7x
topology: tpu7x:2x2x1
jax: 0.10.0
libtpu: 0.0.40
codegen_flags: <defaults>
</compile_context>

<pallas_src>
from functools import partial

import jax
import jax.numpy as jnp
from jax.experimental import pallas as pl
from jax.experimental.pallas import tpu as pltpu


def _attn_prop_kernel(x_ref, kT_ref, v_ref,
                      wq_ref, bq_ref, wm_ref,
                      w1x_ref, w1m_ref, b1_ref, bns_ref, bnb_ref,
                      w2_ref, b2_ref,
                      out_ref, msg_ref, *, exp_dtype):
    f32 = jnp.float32
    bf16 = jnp.bfloat16
    h = pl.program_id(2)
    last_h = pl.num_programs(2) - 1

    x = x_ref[...]                                              # (TN, D) bf16

    @pl.when(h == 0)
    def _init():
        # merge-conv bias is folded into b1 on the host, so start from zero.
        msg_ref[...] = jnp.zeros_like(msg_ref)

    # --- per-head query projection (wq/bq pre-scaled by 1/sqrt(head_dim)).
    q = (jnp.dot(x, wq_ref[...], preferred_element_type=f32)
         + bq_ref[...]).astype(bf16)                            # (TN, hd)

    # --- attention for this head; K/V arrive pre-projected & head-split.
    scores = jnp.dot(q, kT_ref[...], preferred_element_type=f32)   # (TN, M) f32
    smax = jnp.max(scores, axis=-1, keepdims=True)
    # bf16 exp on v6e/v7x (bf16 EUP), f32 on v5e.  The bf16 e feeds BOTH the
    # denominator and the PV matmul so the two stay consistent.
    e = jnp.exp((scores - smax).astype(exp_dtype)).astype(bf16)    # (TN, M)
    denom = jnp.sum(e.astype(f32), axis=-1, keepdims=True)         # (TN, 1)
    pv = jnp.dot(e, v_ref[...], preferred_element_type=f32)        # (TN, hd)
    pv = pv * pl.reciprocal(denom, approx=True)                    # post-PV norm

    # --- merge conv folded per head (no lane-axis concat of heads).
    msg_ref[...] += jnp.dot(pv.astype(bf16), wm_ref[...],
                            preferred_element_type=f32)

    # --- MLP([2D, 2D, D]) once the message is complete.
    @pl.when(h == last_h)
    def _mlp():
        msg = msg_ref[...]
        h1 = (jnp.dot(x, w1x_ref[...], preferred_element_type=f32)
              + jnp.dot(msg.astype(bf16), w1m_ref[...], preferred_element_type=f32)
              + b1_ref[...])
        # TODO(synk): eval-mode BatchNorm1d only (folded scale/shift); training
        #             batch statistics are not reproduced.
        h1 = jnp.maximum(h1 * bns_ref[...] + bnb_ref[...], 0.0)
        out = (jnp.dot(h1.astype(bf16), w2_ref[...], preferred_element_type=f32)
               + b2_ref[...])
        out_ref[...] = out.astype(out_ref.dtype)


def _round_up(x, m):
    return ((x + m - 1) // m) * m


def _vmem_limit_bytes():
    """~25% headroom below the chip's physical VMEM (v5e/v6e 128 MiB, v7x 64 MiB)."""
    cap = None
    try:
        cap = getattr(pltpu.get_tpu_info(), 'vmem_capacity_bytes', None)
    except Exception:
        cap = None
    if not cap:
        cap = 64 * 1024 * 1024
    return int(min(max(cap * 3 // 4, 32 * 1024 * 1024), 128 * 1024 * 1024))


def _exp_dtype():
    """bf16 exp only where the EUP has a bf16 path (v6e / v7x)."""
    try:
        kind = jax.devices()[0].device_kind.lower()
    except Exception:
        return jnp.float32
    if ('v6' in kind) or ('v7' in kind):
        return jnp.bfloat16
    return jnp.float32


def _choose_tile_n(batch, n, m, d, vmem_limit):
    """Query-tile size: multiple of 16 (bf16 sublanes), per-step temporaries
    within ~1/4 of the VMEM budget, capped at 512, and small enough to give
    >= 4 parallel programs (v7x has 2 TensorCores)."""
    n16 = _round_up(n, 16)
    budget = max(vmem_limit // 4, 1 << 20)
    per_row = 6 * m + 24 * d + 16            # scores f32 + e bf16 + x/q/msg/h1/out
    tn = min(budget // per_row, 512, n16)
    tn = max(16, (tn // 16) * 16)
    while batch * ((n16 + tn - 1) // tn) < 4 and tn > 32:
        tn = max(32, ((tn // 2) // 16) * 16)
    return tn


def attentional_propagation(x, source, params, num_heads):
    """x: (B, D, N), source: (B, D, M)  ->  (B, D, N)   (PyTorch NCL layout)."""
    B, D, N = x.shape
    M = source.shape[2]
    assert D % num_heads == 0
    H = num_heads
    hd = D // H
    f32, bf16 = jnp.float32, jnp.bfloat16

    # PyTorch views projected channels as (head_dim, H) with c = d*H + h;
    # regroup head-major: j = h*hd + d.
    perm = jnp.array([d * H + h for h in range(H) for d in range(hd)],
                     dtype=jnp.int32)
    scale = 1.0 / (hd ** 0.5)

    # --- weights (host-side prep; 1/sqrt(hd) folded into wq/bq) -------------
    wq_hs = (params['wq'][perm, :] * scale).reshape(H, hd, D) \
        .transpose(0, 2, 1).astype(bf16)                        # (H, D, hd)
    bq_hs = (params['bq'][perm] * scale).reshape(H, 1, hd).astype(f32)
    wm_hs = params['wm'][:, perm].T.reshape(H, hd, D).astype(bf16)   # (H, hd, D)

    w1 = params['w1']                                            # (2D, 2D) = (out, in)
    w1x = w1[:, :D].T.astype(bf16)                               # (D, 2D)
    w1m_f32 = w1[:, D:].T                                        # (D, 2D) f32
    w1m = w1m_f32.astype(bf16)
    # Fold the merge-conv bias through w1m into b1 (message bias never
    # materialized in the kernel).
    b1 = (params['b1'] + params['bm'] @ w1m_f32)[None, :].astype(f32)
    bn_scale = params['gamma'] / jnp.sqrt(params['var'] + 1e-5)
    bns = bn_scale[None, :].astype(f32)
    bnb = (params['beta'] - params['mean'] * bn_scale)[None, :].astype(f32)
    w2 = params['w2'].T.astype(bf16)                             # (2D, D)
    b2 = params['b2'][None, :].astype(f32)

    # --- K/V projections hoisted out of the kernel (once per batch, in XLA) -
    wk_p, bk_p = params['wk'][perm, :], params['bk'][perm]
    wv_p, bv_p = params['wv'][perm, :], params['bv'][perm]
    k_cf = jnp.einsum('oi,bim->bom', wk_p, source) + bk_p[None, :, None]   # (B, D, M)
    v_cf = jnp.einsum('oi,bim->bom', wv_p, source) + bv_p[None, :, None]   # (B, D, M)
    kT = k_cf.reshape(B, H, hd, M).astype(bf16)                            # (B, H, hd, M)
    v_hs = jnp.transpose(v_cf.reshape(B, H, hd, M), (0, 1, 3, 2)).astype(bf16)  # (B, H, M, hd)

    # Channels-last queries (original channel order, reused by the MLP).
    # TODO(synk): the (B,D,N)<->(B,N,D) transposes could be elided if adjacent
    # SuperGlue layers agreed on a channels-last layout.
    x_t = jnp.transpose(x, (0, 2, 1)).astype(bf16)                          # (B, N, D)

    vmem_limit = _vmem_limit_bytes()
    tile_n = _choose_tile_n(B, N, M, D, vmem_limit)
    n_pad = _round_up(max(N, tile_n), tile_n)
    if n_pad != N:
        x_t = jnp.pad(x_t, ((0, 0), (0, n_pad - N), (0, 0)))

    grid = (B, n_pad // tile_n, H)

    def const_spec(arr):
        nd = arr.ndim
        return pl.BlockSpec(arr.shape, lambda b, n, h, _nd=nd: (0,) * _nd)

    out_t = pl.pallas_call(
        partial(_attn_prop_kernel, exp_dtype=_exp_dtype()),
        out_shape=jax.ShapeDtypeStruct((B, n_pad, D), x.dtype),
        grid=grid,
        in_specs=[
            pl.BlockSpec((None, tile_n, D), lambda b, n, h: (b, n, 0)),        # x tile
            pl.BlockSpec((None, None, hd, M), lambda b, n, h: (b, h, 0, 0)),   # K^T per head
            pl.BlockSpec((None, None, M, hd), lambda b, n, h: (b, h, 0, 0)),   # V per head
            pl.BlockSpec((None, D, hd), lambda b, n, h: (h, 0, 0)),            # Wq per head
            pl.BlockSpec((None, 1, hd), lambda b, n, h: (h, 0, 0)),            # bq per head
            pl.BlockSpec((None, hd, D), lambda b, n, h: (h, 0, 0)),            # Wm per head
            const_spec(w1x), const_spec(w1m), const_spec(b1),
            const_spec(bns), const_spec(bnb),
            const_spec(w2), const_spec(b2),
        ],
        out_specs=pl.BlockSpec((None, tile_n, D), lambda b, n, h: (b, n, 0)),
        scratch_shapes=[pltpu.VMEM((tile_n, D), jnp.float32)],                 # msg acc
        compiler_params=pltpu.CompilerParams(
            dimension_semantics=("parallel", "parallel", "arbitrary"),
            vmem_limit_bytes=vmem_limit),
    )(x_t, kT, v_hs, wq_hs, bq_hs, wm_hs, w1x, w1m, b1, bns, bnb, w2, b2)

    out_t = out_t[:, :N, :]
    return jnp.transpose(out_t, (0, 2, 1))                       # back to (B, D, N)


def _ref_forward(x, source, p, num_heads):
    """Pure-JAX f32 reference following the PyTorch semantics exactly."""
    B, D, N = x.shape
    dim = D // num_heads

    def conv1d(inp, W, b):   # inp (B, Cin, L), W (Cout, Cin)
        return jnp.einsum('oc,bcl->bol', W, inp) + b[None, :, None]

    q = conv1d(x, p['wq'], p['bq']).reshape(B, dim, num_heads, N)
    k = conv1d(source, p['wk'], p['bk']).reshape(B, dim, num_heads, -1)
    v = conv1d(source, p['wv'], p['bv']).reshape(B, dim, num_heads, -1)
    scores = jnp.einsum('bdhn,bdhm->bhnm', q, k) / dim ** 0.5
    prob = jax.nn.softmax(scores, axis=-1)
    o = jnp.einsum('bhnm,bdhm->bdhn', prob, v).reshape(B, D, N)
    message = conv1d(o, p['wm'], p['bm'])
    cat = jnp.concatenate([x, message], axis=1)
    h1 = conv1d(cat, p['w1'], p['b1'])
    scale = p['gamma'] / jnp.sqrt(p['var'] + 1e-5)
    shift = p['beta'] - p['mean'] * scale
    h1 = jnp.maximum(h1 * scale[None, :, None] + shift[None, :, None], 0.0)
    return conv1d(h1, p['w2'], p['b2'])


def _init_params(key, feature_dim):
    D = feature_dim
    ks = jax.random.split(key, 16)
    n = lambda k, shape, s=0.1: (s * jax.random.normal(k, shape)).astype(jnp.float32)
    return {
        'wq': n(ks[0], (D, D)), 'bq': n(ks[1], (D,)),
        'wk': n(ks[2], (D, D)), 'bk': n(ks[3], (D,)),
        'wv': n(ks[4], (D, D)), 'bv': n(ks[5], (D,)),
        'wm': n(ks[6], (D, D)), 'bm': n(ks[7], (D,)),
        'w1': n(ks[8], (2 * D, 2 * D)), 'b1': n(ks[9], (2 * D,)),
        'gamma': 1.0 + n(ks[10], (2 * D,)),
        'beta': n(ks[11], (2 * D,)),
        'mean': n(ks[12], (2 * D,)),
        'var': jax.random.uniform(ks[13], (2 * D,),
                                  minval=0.5, maxval=1.5).astype(jnp.float32),
        'w2': n(ks[14], (D, 2 * D)),
        'b2': jnp.zeros((D,), jnp.float32),   # nn.init.constant_(mlp[-1].bias, 0.)
    }


if __name__ == "__main__":
    B, D, H, N, M = 2, 64, 4, 128, 96
    key = jax.random.PRNGKey(0)
    kx, ks, kp = jax.random.split(key, 3)
    x = jax.random.normal(kx, (B, D, N), dtype=jnp.float32)
    source = jax.random.normal(ks, (B, D, M), dtype=jnp.float32)
    params = _init_params(kp, D)

    out = attentional_propagation(x, source, params, num_heads=H)
    out = jax.block_until_ready(out)

    ref = _ref_forward(x, source, params, num_heads=H)
    assert out.shape == (B, D, N)
    # bf16 MXU operands + (possibly) bf16 exp + approx reciprocal => looser
    # tolerance vs. the f32 reference.
    err = float(jnp.max(jnp.abs(out - ref)))
    assert jnp.allclose(out, ref, rtol=5e-2, atol=5e-2), \
        f"mismatch vs reference (max abs err {err})"
    print("KERNEL_OK")
</pallas_src>

<mosaic_0001>
module attributes {stable_mosaic.version = 11 : i64} {
  func.func @_attn_prop_kernel(%arg0: i32, %arg1: i32, %arg2: i32, %arg3: memref<1x64x64xbf16, #tpu.memory_space<vmem>>, %arg4: memref<1x1x16x96xbf16, #tpu.memory_space<vmem>>, %arg5: memref<1x1x96x16xbf16, #tpu.memory_space<vmem>>, %arg6: memref<1x64x16xbf16, #tpu.memory_space<vmem>>, %arg7: memref<1x1x16xf32, #tpu.memory_space<vmem>>, %arg8: memref<1x16x64xbf16, #tpu.memory_space<vmem>>, %arg9: memref<64x128xbf16, #tpu.memory_space<vmem>>, %arg10: memref<64x128xbf16, #tpu.memory_space<vmem>>, %arg11: memref<1x128xf32, #tpu.memory_space<vmem>>, %arg12: memref<1x128xf32, #tpu.memory_space<vmem>>, %arg13: memref<1x128xf32, #tpu.memory_space<vmem>>, %arg14: memref<128x64xbf16, #tpu.memory_space<vmem>>, %arg15: memref<1x64xf32, #tpu.memory_space<vmem>>, %arg16: memref<1x64x64xf32, #tpu.memory_space<vmem>>, %arg17: memref<64x64xf32, #tpu.memory_space<vmem>>) attributes {dimension_semantics = [#tpu.dimension_semantics<parallel>, #tpu.dimension_semantics<parallel>, #tpu.dimension_semantics<arbitrary>], iteration_bounds = array<i64: 2, 2, 4>, scalar_prefetch = 0 : i64, scratch_operands = 1 : i64, tpu.core_type = #tpu.core_type<tc>, window_params = [{transform_indices = @transform_0, window_bounds = array<i64: 1, 64, 64>}, {transform_indices = @transform_1, window_bounds = array<i64: 1, 1, 16, 96>}, {transform_indices = @transform_2, window_bounds = array<i64: 1, 1, 96, 16>}, {transform_indices = @transform_3, window_bounds = array<i64: 1, 64, 16>}, {transform_indices = @transform_4, window_bounds = array<i64: 1, 1, 16>}, {transform_indices = @transform_5, window_bounds = array<i64: 1, 16, 64>}, {pipeline_mode = #tpu.pipeline_mode<synchronous>, transform_indices = @transform_6, window_bounds = array<i64: 64, 128>}, {pipeline_mode = #tpu.pipeline_mode<synchronous>, transform_indices = @transform_7, window_bounds = array<i64: 64, 128>}, {pipeline_mode = #tpu.pipeline_mode<synchronous>, transform_indices = @transform_8, window_bounds = array<i64: 1, 128>}, {pipeline_mode = #tpu.pipeline_mode<synchronous>, transform_indices = @transform_9, window_bounds = array<i64: 1, 128>}, {pipeline_mode = #tpu.pipeline_mode<synchronous>, transform_indices = @transform_10, window_bounds = array<i64: 1, 128>}, {pipeline_mode = #tpu.pipeline_mode<synchronous>, transform_indices = @transform_11, window_bounds = array<i64: 128, 64>}, {pipeline_mode = #tpu.pipeline_mode<synchronous>, transform_indices = @transform_12, window_bounds = array<i64: 1, 64>}, {transform_indices = @transform_13, window_bounds = array<i64: 1, 64, 64>}]} {
    %c0 = arith.constant 0 : index
    %c0_0 = arith.constant 0 : index
    %c0_1 = arith.constant 0 : index
    %0 = vector.load %arg3[%c0, %c0_0, %c0_1] : memref<1x64x64xbf16, #tpu.memory_space<vmem>>, vector<1x64x64xbf16>
    %1 = vector.shape_cast %0 : vector<1x64x64xbf16> to vector<64x64xbf16>
    %c0_i32 = arith.constant 0 : i32
    %2 = arith.cmpi eq, %arg2, %c0_i32 : i32
    %3 = arith.extui %2 : i1 to i32
    %c0_i32_2 = arith.constant 0 : i32
    %4 = arith.cmpi ne, %3, %c0_i32_2 : i32
    scf.if %4 {
      %cst_30 = arith.constant 0.000000e+00 : f32
      %41 = vector.broadcast %cst_30 : f32 to vector<64x64xf32>
      %c0_31 = arith.constant 0 : index
      %c0_32 = arith.constant 0 : index
      %42 = vector.load %arg17[%c0_31, %c0_32] : memref<64x64xf32, #tpu.memory_space<vmem>>, vector<64x64xf32>
      tpu.vector_store %arg17[%c0_31, %c0_32], %41 {strides = array<i32>} : memref<64x64xf32, #tpu.memory_space<vmem>>, vector<64x64xf32>,
    } else {
    }
    %c0_3 = arith.constant 0 : index
    %c0_4 = arith.constant 0 : index
    %c0_5 = arith.constant 0 : index
    %5 = vector.load %arg6[%c0_3, %c0_4, %c0_5] : memref<1x64x16xbf16, #tpu.memory_space<vmem>>, vector<1x64x16xbf16>
    %6 = vector.shape_cast %5 : vector<1x64x16xbf16> to vector<64x16xbf16>
    %cst = arith.constant dense<0.000000e+00> : vector<64x16xf32>
    %7 = tpu.matmul %1, %6, %cst {dimension_numbers = #tpu.dot_dimension_numbers<[1], [0], [0], [1], [0, 0, 1, 1], [], []>} : vector<64x64xbf16>, vector<64x16xbf16>, vector<64x16xf32> -> vector<64x16xf32>
    %c0_6 = arith.constant 0 : index
    %c0_7 = arith.constant 0 : index
    %c0_8 = arith.constant 0 : index
    %8 = vector.load %arg7[%c0_6, %c0_7, %c0_8] : memref<1x1x16xf32, #tpu.memory_space<vmem>>, vector<1x1x16xf32>
    %9 = vector.shape_cast %8 : vector<1x1x16xf32> to vector<1x16xf32>
    %10 = vector.broadcast %9 : vector<1x16xf32> to vector<64x16xf32>
    %11 = arith.addf %7, %10 : vector<64x16xf32>
    %12 = arith.truncf %11 : vector<64x16xf32> to vector<64x16xbf16>
    %c0_9 = arith.constant 0 : index
    %c0_10 = arith.constant 0 : index
    %c0_11 = arith.constant 0 : index
    %c0_12 = arith.constant 0 : index
    %13 = vector.load %arg4[%c0_9, %c0_10, %c0_11, %c0_12] : memref<1x1x16x96xbf16, #tpu.memory_space<vmem>>, vector<1x1x16x96xbf16>
    %14 = vector.shape_cast %13 : vector<1x1x16x96xbf16> to vector<16x96xbf16>
    %cst_13 = arith.constant dense<0.000000e+00> : vector<64x96xf32>
    %15 = tpu.matmul %12, %14, %cst_13 {dimension_numbers = #tpu.dot_dimension_numbers<[1], [0], [0], [1], [0, 0, 1, 1], [], []>} : vector<64x16xbf16>, vector<16x96xbf16>, vector<64x96xf32> -> vector<64x96xf32>
    %cst_14 = arith.constant dense<0xFF800000> : vector<64xf32>
    %16 = vector.multi_reduction <maximumf>, %15, %cst_14 [1] : vector<64x96xf32> to vector<64xf32>
    %17 = vector.shape_cast %16 : vector<64xf32> to vector<64x1xf32>
    %18 = vector.broadcast %17 : vector<64x1xf32> to vector<64x96xf32>
    %19 = arith.subf %15, %18 : vector<64x96xf32>
    %20 = math.exp %19 : vector<64x96xf32>
    %21 = arith.truncf %20 : vector<64x96xf32> to vector<64x96xbf16>
    %22 = arith.extf %21 : vector<64x96xbf16> to vector<64x96xf32>
    %cst_15 = arith.constant dense<0.000000e+00> : vector<64xf32>
    %23 = vector.multi_reduction <add>, %22, %cst_15 [1] : vector<64x96xf32> to vector<64xf32>
    %24 = vector.shape_cast %23 : vector<64xf32> to vector<64x1xf32>
    %c0_16 = arith.constant 0 : index
    %c0_17 = arith.constant 0 : index
    %c0_18 = arith.constant 0 : index
    %c0_19 = arith.constant 0 : index
    %25 = vector.load %arg5[%c0_16, %c0_17, %c0_18, %c0_19] : memref<1x1x96x16xbf16, #tpu.memory_space<vmem>>, vector<1x1x96x16xbf16>
    %26 = vector.shape_cast %25 : vector<1x1x96x16xbf16> to vector<96x16xbf16>
    %cst_20 = arith.constant dense<0.000000e+00> : vector<64x16xf32>
    %27 = tpu.matmul %21, %26, %cst_20 {dimension_numbers = #tpu.dot_dimension_numbers<[1], [0], [0], [1], [0, 0, 1, 1], [], []>} : vector<64x96xbf16>, vector<96x16xbf16>, vector<64x16xf32> -> vector<64x16xf32>
    %28 = tpu.reciprocal %24 {approx = true} : vector<64x1xf32> -> vector<64x1xf32>
    %29 = vector.broadcast %28 : vector<64x1xf32> to vector<64x16xf32>
    %30 = arith.mulf %27, %29 : vector<64x16xf32>
    %c0_21 = arith.constant 0 : index
    %c0_22 = arith.constant 0 : index
    %31 = vector.load %arg17[%c0_21, %c0_22] : memref<64x64xf32, #tpu.memory_space<vmem>>, vector<64x64xf32>
    %32 = arith.truncf %30 : vector<64x16xf32> to vector<64x16xbf16>
    %c0_23 = arith.constant 0 : index
    %c0_24 = arith.constant 0 : index
    %c0_25 = arith.constant 0 : index
    %33 = vector.load %arg8[%c0_23, %c0_24, %c0_25] : memref<1x16x64xbf16, #tpu.memory_space<vmem>>, vector<1x16x64xbf16>
    %34 = vector.shape_cast %33 : vector<1x16x64xbf16> to vector<16x64xbf16>
    %cst_26 = arith.constant dense<0.000000e+00> : vector<64x64xf32>
    %35 = tpu.matmul %32, %34, %cst_26 {dimension_numbers = #tpu.dot_dimension_numbers<[1], [0], [0], [1], [0, 0, 1, 1], [], []>} : vector<64x16xbf16>, vector<16x64xbf16>, vector<64x64xf32> -> vector<64x64xf32>
    %36 = arith.addf %31, %35 : vector<64x64xf32>
    %c0_27 = arith.constant 0 : index
    %c0_28 = arith.constant 0 : index
    %37 = vector.load %arg17[%c0_27, %c0_28] : memref<64x64xf32, #tpu.memory_space<vmem>>, vector<64x64xf32>
    tpu.vector_store %arg17[%c0_27, %c0_28], %36 {strides = array<i32>} : memref<64x64xf32, #tpu.memory_space<vmem>>, vector<64x64xf32>,
    %c3_i32 = arith.constant 3 : i32
    %38 = arith.cmpi eq, %arg2, %c3_i32 : i32
    %39 = arith.extui %38 : i1 to i32
    %c0_i32_29 = arith.constant 0 : i32
    %40 = arith.cmpi ne, %39, %c0_i32_29 : i32
    scf.if %40 {
      %c0_30 = arith.constant 0 : index
      %c0_31 = arith.constant 0 : index
      %41 = vector.load %arg17[%c0_30, %c0_31] : memref<64x64xf32, #tpu.memory_space<vmem>>, vector<64x64xf32>
      %c0_32 = arith.constant 0 : index
      %c0_33 = arith.constant 0 : index
      %42 = vector.load %arg9[%c0_32, %c0_33] : memref<64x128xbf16, #tpu.memory_space<vmem>>, vector<64x128xbf16>
      %cst_34 = arith.constant dense<0.000000e+00> : vector<64x128xf32>
      %43 = tpu.matmul %1, %42, %cst_34 {dimension_numbers = #tpu.dot_dimension_numbers<[1], [0], [0], [1], [0, 0, 1, 1], [], []>} : vector<64x64xbf16>, vector<64x128xbf16>, vector<64x128xf32> -> vector<64x128xf32>
      %44 = arith.truncf %41 : vector<64x64xf32> to vector<64x64xbf16>
      %c0_35 = arith.constant 0 : index
      %c0_36 = arith.constant 0 : index
      %45 = vector.load %arg10[%c0_35, %c0_36] : memref<64x128xbf16, #tpu.memory_space<vmem>>, vector<64x128xbf16>
      %cst_37 = arith.constant dense<0.000000e+00> : vector<64x128xf32>
      %46 = tpu.matmul %44, %45, %cst_37 {dimension_numbers = #tpu.dot_dimension_numbers<[1], [0], [0], [1], [0, 0, 1, 1], [], []>} : vector<64x64xbf16>, vector<64x128xbf16>, vector<64x128xf32> -> vector<64x128xf32>
      %47 = arith.addf %43, %46 : vector<64x128xf32>
      %c0_38 = arith.constant 0 : index
      %c0_39 = arith.constant 0 : index
      %48 = vector.load %arg11[%c0_38, %c0_39] : memref<1x128xf32, #tpu.memory_space<vmem>>, vector<1x128xf32>
      %49 = vector.broadcast %48 : vector<1x128xf32> to vector<64x128xf32>
      %50 = arith.addf %47, %49 : vector<64x128xf32>
      %c0_40 = arith.constant 0 : index
      %c0_41 = arith.constant 0 : index
      %51 = vector.load %arg12[%c0_40, %c0_41] : memref<1x128xf32, #tpu.memory_space<vmem>>, vector<1x128xf32>
      %52 = vector.broadcast %51 : vector<1x128xf32> to vector<64x128xf32>
      %53 = arith.mulf %50, %52 : vector<64x128xf32>
      %c0_42 = arith.constant 0 : index
      %c0_43 = arith.constant 0 : index
      %54 = vector.load %arg13[%c0_42, %c0_43] : memref<1x128xf32, #tpu.memory_space<vmem>>, vector<1x128xf32>
      %55 = vector.broadcast %54 : vector<1x128xf32> to vector<64x128xf32>
      %56 = arith.addf %53, %55 : vector<64x128xf32>
      %cst_44 = arith.constant 0.000000e+00 : f32
      %57 = vector.broadcast %cst_44 : f32 to vector<64x128xf32>
      %58 = arith.maximumf %56, %57 : vector<64x128xf32>
      %59 = arith.truncf %58 : vector<64x128xf32> to vector<64x128xbf16>
      %c0_45 = arith.constant 0 : index
      %c0_46 = arith.constant 0 : index
      %60 = vector.load %arg14[%c0_45, %c0_46] : memref<128x64xbf16, #tpu.memory_space<vmem>>, vector<128x64xbf16>
      %cst_47 = arith.constant dense<0.000000e+00> : vector<64x64xf32>
      %61 = tpu.matmul %59, %60, %cst_47 {dimension_numbers = #tpu.dot_dimension_numbers<[1], [0], [0], [1], [0, 0, 1, 1], [], []>} : vector<64x128xbf16>, vector<128x64xbf16>, vector<64x64xf32> -> vector<64x64xf32>
      %c0_48 = arith.constant 0 : index
      %c0_49 = arith.constant 0 : index
      %62 = vector.load %arg15[%c0_48, %c0_49] : memref<1x64xf32, #tpu.memory_space<vmem>>, vector<1x64xf32>
      %63 = vector.broadcast %62 : vector<1x64xf32> to vector<64x64xf32>
      %64 = arith.addf %61, %63 : vector<64x64xf32>
      %c0_50 = arith.constant 0 : index
      %c0_51 = arith.constant 0 : index
      %c0_52 = arith.constant 0 : index
      %65 = vector.load %arg16[%c0_50, %c0_51, %c0_52] : memref<1x64x64xf32, #tpu.memory_space<vmem>>, vector<1x64x64xf32>
      %66 = vector.shape_cast %65 : vector<1x64x64xf32> to vector<64x64xf32>
      %67 = vector.shape_cast %64 : vector<64x64xf32> to vector<1x64x64xf32>
      tpu.vector_store %arg16[%c0_50, %c0_51, %c0_52], %67 {strides = array<i32>} : memref<1x64x64xf32, #tpu.memory_space<vmem>>, vector<1x64x64xf32>,
    } else {
    }
    return
  }
  func.func @transform_0(%arg0: i32, %arg1: i32, %arg2: i32) -> (i32, i32, i32) {
    %c0_i32 = arith.constant 0 : i32
    %c0_i32_0 = arith.constant 0 : i32
    return %arg0, %arg1, %c0_i32 : i32, i32, i32
  }
  func.func @transform_1(%arg0: i32, %arg1: i32, %arg2: i32) -> (i32, i32, i32, i32) {
    %c0_i32 = arith.constant 0 : i32
    %c0_i32_0 = arith.constant 0 : i32
    %c0_i32_1 = arith.constant 0 : i32
    return %arg0, %arg2, %c0_i32, %c0_i32_0 : i32, i32, i32, i32
  }
  func.func @transform_2(%arg0: i32, %arg1: i32, %arg2: i32) -> (i32, i32, i32, i32) {
    %c0_i32 = arith.constant 0 : i32
    %c0_i32_0 = arith.constant 0 : i32
    %c0_i32_1 = arith.constant 0 : i32
    return %arg0, %arg2, %c0_i32, %c0_i32_0 : i32, i32, i32, i32
  }
  func.func @transform_3(%arg0: i32, %arg1: i32, %arg2: i32) -> (i32, i32, i32) {
    %c0_i32 = arith.constant 0 : i32
    %c0_i32_0 = arith.constant 0 : i32
    %c0_i32_1 = arith.constant 0 : i32
    return %arg2, %c0_i32, %c0_i32_0 : i32, i32, i32
  }
  func.func @transform_4(%arg0: i32, %arg1: i32, %arg2: i32) -> (i32, i32, i32) {
    %c0_i32 = arith.constant 0 : i32
    %c0_i32_0 = arith.constant 0 : i32
    %c0_i32_1 = arith.constant 0 : i32
    return %arg2, %c0_i32, %c0_i32_0 : i32, i32, i32
  }
  func.func @transform_5(%arg0: i32, %arg1: i32, %arg2: i32) -> (i32, i32, i32) {
    %c0_i32 = arith.constant 0 : i32
    %c0_i32_0 = arith.constant 0 : i32
    %c0_i32_1 = arith.constant 0 : i32
    return %arg2, %c0_i32, %c0_i32_0 : i32, i32, i32
  }
  func.func @transform_6(%arg0: i32, %arg1: i32, %arg2: i32) -> (i32, i32) {
    %c0_i32 = arith.constant 0 : i32
    %c0_i32_0 = arith.constant 0 : i32
    %c0_i32_1 = arith.constant 0 : i32
    return %c0_i32, %c0_i32_0 : i32, i32
  }
  func.func @transform_7(%arg0: i32, %arg1: i32, %arg2: i32) -> (i32, i32) {
    %c0_i32 = arith.constant 0 : i32
    %c0_i32_0 = arith.constant 0 : i32
    %c0_i32_1 = arith.constant 0 : i32
    return %c0_i32, %c0_i32_0 : i32, i32
  }
  func.func @transform_8(%arg0: i32, %arg1: i32, %arg2: i32) -> (i32, i32) {
    %c0_i32 = arith.constant 0 : i32
    %c0_i32_0 = arith.constant 0 : i32
    %c0_i32_1 = arith.constant 0 : i32
    return %c0_i32, %c0_i32_0 : i32, i32
  }
  func.func @transform_9(%arg0: i32, %arg1: i32, %arg2: i32) -> (i32, i32) {
    %c0_i32 = arith.constant 0 : i32
    %c0_i32_0 = arith.constant 0 : i32
    %c0_i32_1 = arith.constant 0 : i32
    return %c0_i32, %c0_i32_0 : i32, i32
  }
  func.func @transform_10(%arg0: i32, %arg1: i32, %arg2: i32) -> (i32, i32) {
    %c0_i32 = arith.constant 0 : i32
    %c0_i32_0 = arith.constant 0 : i32
    %c0_i32_1 = arith.constant 0 : i32
    return %c0_i32, %c0_i32_0 : i32, i32
  }
  func.func @transform_11(%arg0: i32, %arg1: i32, %arg2: i32) -> (i32, i32) {
    %c0_i32 = arith.constant 0 : i32
    %c0_i32_0 = arith.constant 0 : i32
    %c0_i32_1 = arith.constant 0 : i32
    return %c0_i32, %c0_i32_0 : i32, i32
  }
  func.func @transform_12(%arg0: i32, %arg1: i32, %arg2: i32) -> (i32, i32) {
    %c0_i32 = arith.constant 0 : i32
    %c0_i32_0 = arith.constant 0 : i32
    %c0_i32_1 = arith.constant 0 : i32
    return %c0_i32, %c0_i32_0 : i32, i32
  }
  func.func @transform_13(%arg0: i32, %arg1: i32, %arg2: i32) -> (i32, i32, i32) {
    %c0_i32 = arith.constant 0 : i32
    %c0_i32_0 = arith.constant 0 : i32
    return %arg0, %arg1, %c0_i32 : i32, i32, i32
  }
}

</mosaic_0001>

<bundles_post_ra>
// kernel: tpu_custom_call.1
= control target key start
LH: loop header
LB: loop body
LE: loop exit
PB: predicated region body
PF: predicated region fallthrough
CT: control target
= control target key end

     0   :  { %s2299_s25 = smov 0   ;;  %s2301_s26 = smov 0   ;;  %s2557_s0 = inlined_call_operand.vmem [shape: bf16[2,128,64], index: 0, kind: input, shape index: {}]   ;;  %s2558_s1 = inlined_call_operand.vmem [shape: bf16[2,4,16,96], index: 1, kind: input, shape index: {}]   ;;  %s2559_s2 = inlined_call_operand.vmem [shape: bf16[2,4,96,16], index: 2, kind: input, shape index: {}]   ;;  %s2560_s3 = inlined_call_operand.vmem [shape: bf16[4,64,16], index: 3, kind: input, shape index: {}]   ;;  %s2561_s4 = inlined_call_operand.vmem [shape: f32[4,1,16], index: 4, kind: input, shape index: {}]   ;;  %s2562_s5 = inlined_call_operand.vmem [shape: bf16[4,16,64], index: 5, kind: input, shape index: {}]   ;;  %s2563_s6 = inlined_call_operand.vmem [shape: bf16[64,128], index: 6, kind: input, shape index: {}]   ;;  %s2564_s7 = inlined_call_operand.vmem [shape: bf16[64,128], index: 7, kind: input, shape index: {}]   ;;  %s2565_s8 = inlined_call_operand.vmem [shape: f32[1,128], index: 8, kind: input, shape index: {}]   ;;  %s2566_s9 = inlined_call_operand.vmem [shape: f32[1,128], index: 9, kind: input, shape index: {}]   ;;  %s2567_s10 = inlined_call_operand.vmem [shape: f32[1,128], index: 10, kind: input, shape index: {}]   ;;  %s2568_s11 = inlined_call_operand.vmem [shape: bf16[128,64], index: 11, kind: input, shape index: {}]   ;;  %s2569_s12 = inlined_call_operand.vmem [shape: f32[1,64], index: 12, kind: input, shape index: {}]   ;;  %s2570_s13 = inlined_call_operand.vmem [shape: f32[2,128,64], index: 13, kind: output, shape index: {}]  }
   0x1   :  { %2576 = sst [smem:[#allocation11_spill]] %s2557_s0  ;;  %s2303_s27 = smov 0  }
   0x2   :  { %2577 = sst [smem:[#allocation12_spill]] %s2567_s10  ;;  %s2305_s28 = smov 0  }
   0x3   :  { %2578 = sst [smem:[#allocation13_spill]] %s2569_s12  ;;  %s2307_s29 = smov 0  }
   0x4   :  { %2579 = sst [smem:[#allocation14_spill]] %s2570_s13  ;;  %s2309_s30 = smov 0  }
   0x5   :  { %s2311_s14 = smov 0  }
   0x6 LB: > { %2580 = sst [smem:[#allocation3_spill]] %s2214_s28  ;;  %s35_s15 = sadd.s32 1, %s2214_s28  ;;  %s2226_s14 = sphi %s2311_s14, %s23_s14   ;;  %s2222_s30 = sphi %s2309_s30, %s2599_s30   ;;  %s2218_s29 = sphi %s2307_s29, %s2598_s29   ;;  %s2214_s28 = sphi %s2305_s28, %s2597_s28   ;;  %s2210_s27 = sphi %s2303_s27, %s2596_s27   ;;  %s2206_s26 = sphi %s2301_s26, %s2595_s26   ;;  %s2202_s25 = sphi %s2299_s25, %s2594_s25  }
   0x7   : > { %2581 = sst [smem:[#allocation4_spill]] %s2218_s29  ;;  %p36_p0 = scmp.ge.s32.totalorder %s35_s15, 4 }
   0x8   : > { %2582 = sst [smem:[#allocation5_spill]] %s2222_s30  ;;  %s38_s16 = sadd.s32 1, %s2218_s29 }
   0x9   : > { %2583 = sst [smem:[#allocation6_spill]] %s2226_s14  ;;  %p1795_p1 = scmp.ge.s32.totalorder %s2226_s14, 1 }
   0xa   : > { %p475_p2 = scmp.lt.s32.totalorder %s2226_s14, 17  ;;  %s2601_s15 = smov (%p36_p0, %s35_s15), 0 }
   0xb   : > { %2584 = sst [smem:[#allocation7_spill]] %s2601_s15  ;;  %s2603_s16 = smov (!%p36_p0, %s38_s16), %s2218_s29 }
   0xc   : > { %p476_p3 = pnand %p1795_p1, %p475_p2  ;;  %p40_p4 = scmp.ge.s32.totalorder %s2603_s16, 2 }
   0xd   : > { %s42_s17 = sadd.s32 1, %s2222_s30 }
   0xe   : > { %s2605_s16 = smov (%p40_p4, %s2603_s16), 0  ;;  %s2607_s17 = smov (!%p40_p4, %s42_s17), %s2222_s30 }
   0xf   : > { %2585 = sst [smem:[#allocation8_spill]] %s2605_s16  ;;  %p44_p5 = scmp.ge.s32.totalorder %s2607_s17, 2 }
  0x10   : > { %479 = sbr.rel (%p476_p3) target bundleno = 1579 (0x62b), region = 72 }
  0x11   : > { %s2609_s17 = smov (%p44_p5, %s2607_s17), 0 }
  0x12   : > { %2586 = sst [smem:[#allocation9_spill]] %s2609_s17 }
  0x17   : > { %s1796_s18 = sshll.u32 %s2206_s26, 3  ;;  %p559_p6 = scmp.lt.s32.totalorder %s2210_s27, 1 }
  0x18   : > { %p561_p7 = scmp.lt.s32.totalorder %s1796_s18, 15  ;;  %p570_p8 = scmp.lt.s32.totalorder %s2202_s25, 3 }
  0x19   : > { %s2611_s27 = smov (!%p559_p6, %s2210_s27), 1  ;;  %s2587_s0 = sld [smem:[#allocation11_spill]] }
  0x1a   : > { %s2613_s18 = smov (!%p561_p7, %s1796_s18), 15  ;;  %s1797_s19 = sshll.u32 %s2611_s27, 4 }
  0x1b   : > { %s1800_s20 = sshll.u32 %s2611_s27, 3  ;;  %s564_s21 = sadd.s32 %s1797_s19, %s2613_s18 }
  0x1c   : > { %s2054_s22 = smul.u32 48, %s2611_s27  ;;  %s1798_s23 = sshll.u32 %s564_s21, 2 }
  0x1d   : > { %s1809_s24 = sshll.u32 %s564_s21, 3  ;;  %s2588_s13 = sld [smem:[#allocation14_spill]] }
  0x1e   : > { %s2353_s28 = scalar_select %p570_p8, %s2202_s25, 3 }
  0x1f   : > { %s566_s30 = scalar_lea.vmem %s2587_s0, %s1798_s23  ;;  %p1810_p9 = scmp.ne.s32.totalorder %s2202_s25, 0 }
  0x20   : > { %v610_v0 = vld [vmem:[%s566_s30] sm:$0xf]  ;;  %v611_v1 = vld [vmem:[%s566_s30 + $0x4] sm:$0xf]  ;;  %v612_v2 = vld [vmem:[%s566_s30 + $0x8] sm:$0xf] }
  0x21   : > { %v613_v3 = vld [vmem:[%s566_s30 + $0xc] sm:$0xf]  ;;  %v614_v4 = vld [vmem:[%s566_s30 + $0x10] sm:$0xf]  ;;  %s1799_s27 = sshll.u32 %s2353_s28, 1  ;;  %s2053_s15 = smul.u32 12, %s2353_s28 }
  0x22   : > { %v615_v5 = vld [vmem:[%s566_s30 + $0x14] sm:$0xf]  ;;  %v616_v6 = vld [vmem:[%s566_s30 + $0x18] sm:$0xf]  ;;  %s574_s16 = sadd.s32 %s1800_s20, %s1799_s27  ;;  %s1875_s29 = sshll.u32 %s2353_s28, 5  ;;  %vm622_vm0 = vcmask (!%p1810_p9), 523264  }
  0x23   : > { %s2350_s26 = scalar_lea.vmem %s2588_s13, %s1809_s24  ;;  %v617_v7 = vld [vmem:[%s566_s30 + $0x1c] sm:$0xf]  ;;  %s1801_s17 = sshll.u32 %s574_s16, 2  ;;  %v2228_v8 = vmov (!%p1810_p9), 0.0  }
  0x24   : > { %2589 = sst [smem:[#allocation10_spill]] %s2350_s26  ;;  %s583_s18 = sadd.s32 %s2054_s22, %s2053_s15  ;;  %623 = vst.msk [vmem:[#allocation2] sm:$0xff] (!%p1810_p9), %vm622_vm0, %v2228_v8  ;;  %624 = vst.msk [vmem:[#allocation2 + $0x8] sm:$0xff] (!%p1810_p9), %vm622_vm0, %v2228_v8 }
  0x25   : > { %s2361_s23 = scalar_lea.vmem %s2558_s1, %s1801_s17  ;;  %s1802_s24 = sshll.u32 %s583_s18, 2  ;;  %625 = vst.msk [vmem:[#allocation2 + $0x10] sm:$0xff] (!%p1810_p9), %vm622_vm0, %v2228_v8  ;;  %626 = vst.msk [vmem:[#allocation2 + $0x18] sm:$0xff] (!%p1810_p9), %vm622_vm0, %v2228_v8 }
  0x26   : > { %s2366_s14 = scalar_lea.vmem %s2559_s2, %s1802_s24  ;;  %s590_s10 = scalar_lea.vmem %s2560_s3, %s1875_s29  ;;  %627 = vst.msk [vmem:[#allocation2 + $0x20] sm:$0xff] (!%p1810_p9), %vm622_vm0, %v2228_v8  ;;  %628 = vst.msk [vmem:[#allocation2 + $0x28] sm:$0xff] (!%p1810_p9), %vm622_vm0, %v2228_v8 }
  0x27   : > { %s593_s30 = scalar_lea.vmem %s2561_s4, %s2353_s28  ;;  %s1876_s22 = sshll.u32 %s2353_s28, 3  ;;  %629 = vst.msk [vmem:[#allocation2 + $0x30] sm:$0xff] (!%p1810_p9), %vm622_vm0, %v2228_v8  ;;  %630 = vst.msk [vmem:[#allocation2 + $0x38] sm:$0xff] (!%p1810_p9), %vm622_vm0, %v2228_v8 }
  0x28   : > { %s2379_s17 = scalar_lea.vmem %s2562_s5, %s1876_s22  ;;  %621 = sbr.rel (%p1810_p9) target bundleno = 47 (0x2f), region = 76 }
  0x2f PF: > { %v2112_v9 = vld [vmem:[%s590_s10] sm:$0xff]   ;;  %v2382_v10 = vcombine.low %v610_v0, %v611_v1  ;;  %vm690_vm1 = vcmask 523264   ;;  %v2113_v11 = vld [vmem:[%s590_s10 + $0x8] sm:$0xff]   ;;  %v2114_v12 = vld [vmem:[%s590_s10 + $0x10] sm:$0xff]   ;;  %v2386_v14 = vcombine.low %v612_v2, %v613_v3  ;;  %v2388_v15 = vcombine.low %v614_v4, %v615_v5  ;;  %p1844_p10 = scmp.ne.s32.totalorder %s2202_s25, 3 }
  0x30   : > { %1933 = vmatprep.subr.bf16.mxu0 %v2112_v9  ;;  %v2115_v13 = vld [vmem:[%s590_s10 + $0x18] sm:$0xff]   ;;  %v2394_v16 = vcombine.low %v616_v6, %v617_v7  ;;  %v2116_v17 = vld [vmem:[%s2361_s23] sm:$0xff]   ;;  %vm780_vm2 = vcmask 130048   ;;  %vm858_vm3 = vcmask 785408   ;;  %v2118_v56 = vld [vmem:[%s2366_s14 + $0x8] sm:$0xff]   ;;  %s2590_s16 = sld [smem:[#allocation12_spill]] (!%p1844_p10) }
  0x31   : > { %1941 = vmatprep.mubr.msk.bf16.mxu0 %vm690_vm1, %v2382_v10  ;;  %1934 = vmatpush3.bf16.msra.mxu0 %v2112_v9  ;;  %v1811_v19 = vld [vmem:[%s593_s30] ss:$0 sm:$0xff]  ;;  %v2119_v57 = vld [vmem:[%s2366_s14 + $0x10] sm:$0xff]   ;;  %v2120_v58 = vld [vmem:[%s2366_s14 + $0x18] sm:$0xff]   ;;  %s2592_s12 = sld [smem:[#allocation13_spill]] (!%p1844_p10) }
  0x32   : > { %1935 = vmatprep.subr.bf16.mxu0 %v2113_v11  ;;  %1949 = vmatprep.subr.bf16.mxu1 %v2116_v17  ;;  %v2117_v39 = vld [vmem:[%s2366_s14] sm:$0xff]   ;;  %v2122_v60 = vld [vmem:[%s2366_s14 + $0x28] sm:$0xff]  }
  0x33   : > { %1950 = vmatpush3.bf16.msra.mxu1 %v2116_v17  ;;  %v2121_v59 = vld [vmem:[%s2366_s14 + $0x20] sm:$0xff]  }
  0x34   : > { %1959 = vmatprep.subr.bf16.mxu1 %v2117_v39 }
  0x35   : > { %1936 = vmatpush3.bf16.msra.mxu0 %v2113_v11 }
  0x36   : > { %1937 = vmatprep.subr.bf16.mxu0 %v2114_v12 }
  0x39   : > { %1938 = vmatpush3.bf16.msra.mxu0 %v2114_v12 }
  0x3a   : > { %1939 = vmatprep.subr.bf16.mxu0 %v2115_v13 }
  0x3d   : > { %1940 = vmatpush3.bf16.msra.mxu0 %v2115_v13 }
  0x40   : > { %1942 = vmatmul.mubr.msk.bf16.vlgmr.msra.gmra.mrb[0].mxu0 %vm690_vm1, %v2386_v14 }
  0x41   : > { %1945 = vmatprep.mubr.msk.bf16.mxu0 %vm690_vm1, %v2388_v15 }
  0x48   : > { %1946 = vmatmul.mubr.msk.bf16.gmra.mrb[4].mxu0 %vm690_vm1, %v2394_v16 }
 0x113   : > { %v1943_v18 = vpop.f32.mrb[0].mxu0 }
 0x114   : > { %v737_v20 = vpop.f32.mrb[1].mxu0  ;;  %v746_v22 = vadd.f32 %v1943_v18, %v1811_v19 }
 0x115   : > { %v1944_v21 = vpop.f32.mrb[2].mxu0  ;;  %v738_v25 = vadd.f32 %v1811_v19, %v737_v20 }
 0x116   : > { %v749_v23 = vadd.f32 %v1944_v21, %v1811_v19  ;;  %v740_v24 = vpop.f32.mrb[3].mxu0 }
 0x117   : > { %v741_v26 = vadd.f32 %v1811_v19, %v740_v24 }
 0x118   : > { %v769_v27 = vpack.c.bf16 %v749_v23, %v746_v22 }
 0x119   : > { %v768_v28 = vpack.c.bf16 %v741_v26, %v738_v25 }
 0x11b   : > { %v1947_v29 = vpop.f32.mrb[4].mxu0  ;;  %1951 = vmatprep.mubr.msk.bf16.mxu1 %vm780_vm2, %v768_v28 }
 0x11c   : > { %v753_v30 = vpop.f32.mrb[5].mxu0  ;;  %1952 = vmatmul.mubr.msk.bf16.vlgmr.msra.gmra.mrb[0].mxu1 %vm780_vm2, %v769_v27  ;;  %v762_v32 = vadd.f32 %v1947_v29, %v1811_v19 }
 0x11d   : > { %v1948_v31 = vpop.f32.mrb[6].mxu0  ;;  %v754_v35 = vadd.f32 %v1811_v19, %v753_v30  ;;  %1960 = vmatpush3.bf16.msra.mxu1 %v2117_v39 }
 0x11e   : > { %v765_v33 = vadd.f32 %v1948_v31, %v1811_v19  ;;  %v756_v34 = vpop.f32.mrb[7].mxu0  ;;  %1961 = vmatprep.subr.bf16.mxu1 %v2118_v56 }
 0x11f   : > { %v757_v36 = vadd.f32 %v1811_v19, %v756_v34 }
 0x120   : > { %v771_v37 = vpack.c.bf16 %v765_v33, %v762_v32 }
 0x121   : > { %v770_v38 = vpack.c.bf16 %v757_v36, %v754_v35  ;;  %1962 = vmatpush3.bf16.msra.mxu1 %v2118_v56 }
 0x122   : > { %1963 = vmatprep.subr.bf16.mxu1 %v2119_v57 }
 0x123   : > { %1955 = vmatprep.mubr.msk.bf16.mxu1 %vm780_vm2, %v770_v38 }
 0x124   : > { %1956 = vmatmul.mubr.msk.bf16.gmra.mrb[4].mxu1 %vm780_vm2, %v771_v37 }
 0x125   : > { %1964 = vmatpush3.bf16.msra.mxu1 %v2119_v57 }
 0x126   : > { %1965 = vmatprep.subr.bf16.mxu1 %v2120_v58 }
 0x129   : > { %1966 = vmatpush3.bf16.msra.mxu1 %v2120_v58 }
 0x12a   : > { %1967 = vmatprep.subr.bf16.mxu1 %v2121_v59 }
 0x12d   : > { %1968 = vmatpush3.bf16.msra.mxu1 %v2121_v59 }
 0x12e   : > { %1969 = vmatprep.subr.bf16.mxu1 %v2122_v60 }
 0x131   : > { %1970 = vmatpush3.bf16.msra.mxu1 %v2122_v60 }
 0x1ef   : > { %v1953_v40 = vpop.f32.mrb[0].mxu1 }
 0x1f0   : > { %v827_v41 = vpop.f32.mrb[1].mxu1  ;;  %v865_v42 = vsel %vm858_vm3, %v1953_v40, -inf }
 0x1f1   : > { %866 = vmax.xlane.f32.xlu1 %v865_v42  ;;  %v1954_v43 = vpop.f32.mrb[2].mxu1  ;;  %v859_v44 = vsel %vm858_vm3, %v827_v41, -inf }
 0x1f2   : > { %860 = vmax.xlane.f32.xlu0 %v859_v44  ;;  %v830_v45 = vpop.f32.mrb[3].mxu1  ;;  %v868_v46 = vsel %vm858_vm3, %v1954_v43, -inf }
 0x1f3   : > { %v862_v47 = vsel %vm858_vm3, %v830_v45, -inf }
 0x1f5   : > { %869 = vmax.xlane.f32.xlu1 %v868_v46 }
 0x1f6   : > { %863 = vmax.xlane.f32.xlu0 %v862_v47 }
 0x1f7   : > { %v1957_v48 = vpop.f32.mrb[4].mxu1 }
 0x1f8   : > { %v843_v49 = vpop.f32.mrb[5].mxu1  ;;  %v877_v54 = vsel %vm858_vm3, %v1957_v48, -inf }
 0x1f9   : > { %v1958_v50 = vpop.f32.mrb[6].mxu1  ;;  %v871_v51 = vsel %vm858_vm3, %v843_v49, -inf }
 0x1fa   : > { %872 = vmax.xlane.f32.xlu0 %v871_v51  ;;  %v846_v52 = vpop.f32.mrb[7].mxu1  ;;  %v880_v55 = vsel %vm858_vm3, %v1958_v50, -inf }
 0x1fb   : > { %v874_v53 = vsel %vm858_vm3, %v846_v52, -inf }
 0x1fc   : > { %875 = vmax.xlane.f32.xlu1 %v874_v53  ;;  %v2123_v53 = vld [vmem:[%s2379_s17] sm:$0xff]   ;;  %s2591_s17 = sld [smem:[#allocation10_spill]] (!%p1844_p10) }
 0x1fd   : > { %1979 = vmatprep.subr.bf16.mxu0 %v2123_v53 }
 0x1fe   : > { %878 = vmax.xlane.f32.xlu0 %v877_v54  ;;  %1980 = vmatpush3.bf16.msra.mxu0 %v2123_v53 }
 0x200   : > { %881 = vmax.xlane.f32.xlu1 %v880_v55 }
 0x27e   : > { %v867_v61 = vpop.xlane.xlu1 %866 }
 0x27f   : > { %v885_v62 = vsub.f32 %v1953_v40, %v867_v61  ;;  %v861_v63 = vpop.xlane.xlu0 %860 }
 0x280   : > { %v883_v0 = vsub.f32 %v827_v41, %v861_v63 }
 0x281   : > { %v895_v1 = vmul.f32 1.442695, %v885_v62 }
 0x282   : > { %v891_v2 = vmul.f32 1.442695, %v883_v0  ;;  %v870_v3 = vpop.xlane.xlu1 %869 }
 0x283   : > { %v886_v4 = vsub.f32 %v1954_v43, %v870_v3  ;;  %v864_v5 = vpop.xlane.xlu0 %863  ;;  %2124 = vpow2.f32 %v895_v1 }
 0x284   : > { %v884_v6 = vsub.f32 %v830_v45, %v864_v5  ;;  %2126 = vpow2.f32 %v891_v2 }
 0x285   : > { %v897_v7 = vmul.f32 1.442695, %v886_v4 }
 0x286   : > { %v893_v8 = vmul.f32 1.442695, %v884_v6 }
 0x287   : > { %2128 = vpow2.f32 %v897_v7  ;;  %v873_v9 = vpop.xlane.xlu0 %872 }
 0x288   : > { %2130 = vpow2.f32 %v893_v8  ;;  %v887_v11 = vsub.f32 %v843_v49, %v873_v9 }
 0x289   : > { %v876_v12 = vpop.xlane.xlu1 %875 }
 0x28a   : > { %v899_v13 = vmul.f32 1.442695, %v887_v11  ;;  %v888_v17 = vsub.f32 %v846_v52, %v876_v12 }
 0x28b   : > { %v879_v18 = vpop.xlane.xlu0 %878 }
 0x28c   : > { %v901_v19 = vmul.f32 1.442695, %v888_v17  ;;  %v889_v20 = vsub.f32 %v1957_v48, %v879_v18  ;;  %2132 = vpow2.f32 %v899_v13 }
 0x28d   : > { %v882_v21 = vpop.xlane.xlu1 %881  ;;  %v2125_v24 = vpop.eup %2124 }
 0x28e   : > { %2134 = vpow2.f32 %v901_v19  ;;  %v903_v22 = vmul.f32 1.442695, %v889_v20  ;;  %v890_v23 = vsub.f32 %v1958_v50, %v882_v21  ;;  %v2127_v25 = vpop.eup %2126 }
 0x290   : > { %v905_v26 = vmul.f32 1.442695, %v890_v23  ;;  %2136 = vpow2.f32 %v903_v22 }
 0x291   : > { %v2129_v27 = vpop.eup %2128 }
 0x292   : > { %v2131_v28 = vpop.eup %2130  ;;  %v908_v29 = vpack.c.bf16 %v2129_v27, %v2125_v24  ;;  %2138 = vpow2.f32 %v905_v26 }
 0x293   : > { %v907_v30 = vpack.c.bf16 %v2131_v28, %v2127_v25 }
 0x294   : > { %v913_v36 = vunpack.c.l.bf16 %v908_v29  ;;  %v914_v37 = vunpack.c.h.bf16 %v908_v29 }
 0x295   : > { %1971 = vmatprep.mubr.msk.bf16.mxu1 %vm858_vm3, %v907_v30  ;;  %v911_v31 = vunpack.c.l.bf16 %v907_v30  ;;  %v912_v32 = vunpack.c.h.bf16 %v907_v30  ;;  %v1086_v30 = vld [vmem:[#allocation2 + $0x10] sm:$0xff] }
 0x296   : > { %1972 = vmatmul.mubr.msk.bf16.vlgmr.msra.gmra.mrb[8].mxu1 %vm858_vm3, %v908_v29  ;;  %v2133_v33 = vpop.eup %2132  ;;  %v925_v41 = vsel %vm858_vm3, %v913_v36, 0.0  ;;  %v928_v42 = vsel %vm858_vm3, %v914_v37, 0.0  ;;  %v1085_v36 = vld [vmem:[#allocation2 + $0x8] sm:$0xff] }
 0x297   : > { %v919_v34 = vsel %vm858_vm3, %v911_v31, 0.0  ;;  %v922_v35 = vsel %vm858_vm3, %v912_v32, 0.0  ;;  %v1084_v31 = vld [vmem:[#allocation2] sm:$0xff] }
 0x298   : > { %v2135_v38 = vpop.eup %2134  ;;  %920 = vadd.xlane.f32.xlu0 %v919_v34  ;;  %923 = vadd.xlane.f32.xlu1 %v922_v35 }
 0x299   : > { %v909_v39 = vpack.c.bf16 %v2135_v38, %v2133_v33  ;;  %v1087_v33 = vld [vmem:[#allocation2 + $0x18] sm:$0xff] }
 0x29a   : > { %v2137_v40 = vpop.eup %2136 }
 0x29b   : > { %1975 = vmatprep.mubr.msk.bf16.mxu1 %vm858_vm3, %v909_v39  ;;  %v916_v43 = vunpack.c.h.bf16 %v909_v39  ;;  %v915_v44 = vunpack.c.l.bf16 %v909_v39 }
 0x29c   : > { %v2139_v45 = vpop.eup %2138  ;;  %926 = vadd.xlane.f32.xlu0 %v925_v41  ;;  %929 = vadd.xlane.f32.xlu1 %v928_v42  ;;  %v1090_v42 = vld [vmem:[#allocation2 + $0x30] sm:$0xff] }
 0x29d   : > { %v910_v46 = vpack.c.bf16 %v2139_v45, %v2137_v40  ;;  %v934_v47 = vsel %vm858_vm3, %v916_v43, 0.0  ;;  %v931_v48 = vsel %vm858_vm3, %v915_v44, 0.0  ;;  %v1088_v43 = vld [vmem:[#allocation2 + $0x20] sm:$0xff]  ;;  %v1091_v45 = vld [vmem:[#allocation2 + $0x38] sm:$0xff] }
 0x29f   : > { %1976 = vmatmul.mubr.msk.bf16.gmra.mrb[12].mxu1 %vm858_vm3, %v910_v46  ;;  %v918_v49 = vunpack.c.h.bf16 %v910_v46  ;;  %v917_v50 = vunpack.c.l.bf16 %v910_v46 }
 0x2a0   : > { %935 = vadd.xlane.f32.xlu1 %v934_v47  ;;  %932 = vadd.xlane.f32.xlu0 %v931_v48  ;;  %v1089_v48 = vld [vmem:[#allocation2 + $0x28] sm:$0xff] }
 0x2a1   : > { %v940_v51 = vsel %vm858_vm3, %v918_v49, 0.0  ;;  %v937_v52 = vsel %vm858_vm3, %v917_v50, 0.0 }
 0x2a4   : > { %941 = vadd.xlane.f32.xlu1 %v940_v51  ;;  %938 = vadd.xlane.f32.xlu0 %v937_v52 }
 0x325   : > { %v921_v54 = vpop.xlane.xlu0 %920  ;;  %v924_v55 = vpop.xlane.xlu1 %923 }
 0x326   : > { %2140 = vrcp.f32 %v921_v54  ;;  %v2156_v54 = vld [vmem:[%s2564_s7] sm:$0xff] (!%p1844_p10)  }
 0x327   : > { %1989 = vmatprep.subr.bf16.mxu0 (!%p1844_p10), %v2156_v54 }
 0x329   : > { %v927_v56 = vpop.xlane.xlu0 %926  ;;  %v930_v57 = vpop.xlane.xlu1 %929 }
 0x32a   : > { %2142 = vrcp.f32 %v927_v56  ;;  %v2158_v56 = vld [vmem:[%s2564_s7 + $0x10] sm:$0xff] (!%p1844_p10)  }
 0x32b   : > { %2144 = vrcp.f32 %v930_v57 }
 0x32c   : > { %2146 = vrcp.f32 %v924_v55  ;;  %v2157_v55 = vld [vmem:[%s2564_s7 + $0x8] sm:$0xff] (!%p1844_p10)  }
 0x32d   : > { %v933_v58 = vpop.xlane.xlu0 %932  ;;  %v936_v59 = vpop.xlane.xlu1 %935 }
 0x32e   : > { %2148 = vrcp.f32 %v933_v58 }
 0x330   : > { %v2141_v62 = vpop.eup %2140 }
 0x331   : > { %v939_v60 = vpop.xlane.xlu0 %938  ;;  %v942_v61 = vpop.xlane.xlu1 %941 }
 0x332   : > { %2150 = vrcp.f32 %v939_v60  ;;  %v2159_v60 = vld [vmem:[%s2564_s7 + $0x18] sm:$0xff] (!%p1844_p10)  }
 0x333   : > { %2152 = vrcp.f32 %v942_v61 }
 0x334   : > { %v2143_v0 = vpop.eup %2142  ;;  %2154 = vrcp.f32 %v936_v59 }
 0x335   : > { %v2145_v2 = vpop.eup %2144 }
 0x336   : > { %v2147_v4 = vpop.eup %2146 }
 0x338   : > { %v2149_v13 = vpop.eup %2148 }
 0x33c   : > { %v2151_v18 = vpop.eup %2150 }
 0x33d   : > { %v2153_v20 = vpop.eup %2152 }
 0x33e   : > { %v2155_v22 = vpop.eup %2154 }
 0x369   : > { %v1973_v63 = vpop.f32.mrb[8].mxu1 }
 0x36a   : > { %v1037_v1 = vpop.f32.mrb[9].mxu1  ;;  %v1078_v5 = vmul.f32 %v2143_v0, %v1973_v63  ;;  %v2160_v63 = vld [vmem:[%s2563_s6] sm:$0xff] (!%p1844_p10)  }
 0x36b   : > { %v1974_v3 = vpop.f32.mrb[10].mxu1  ;;  %v1076_v8 = vmul.f32 %v2141_v62, %v1037_v1 }
 0x36c   : > { %v1079_v6 = vmul.f32 %v2145_v2, %v1974_v3  ;;  %v1040_v7 = vpop.f32.mrb[11].mxu1  ;;  %v2164_v2 = vld [vmem:[%s2568_s11] sm:$0xff] (!%p1844_p10)   ;;  %v2165_v3 = vld [vmem:[%s2568_s11 + $0x8] sm:$0xff] (!%p1844_p10)  }
 0x36d   : > { %v1077_v9 = vmul.f32 %v2147_v4, %v1040_v7  ;;  %2021 = vmatprep.subr.bf16.mxu1 (!%p1844_p10), %v2164_v2  ;;  %v2166_v7 = vld [vmem:[%s2568_s11 + $0x10] sm:$0xff] (!%p1844_p10)  }
 0x36e   : > { %v1093_v11 = vpack.c.bf16 %v1079_v6, %v1078_v5  ;;  %v2161_v5 = vld [vmem:[%s2563_s6 + $0x8] sm:$0xff] (!%p1844_p10)   ;;  %2022 = vmatpush3.bf16.msra.mxu1 (!%p1844_p10), %v2164_v2 }
 0x36f   : > { %v1092_v12 = vpack.c.bf16 %v1077_v9, %v1076_v8  ;;  %2023 = vmatprep.subr.bf16.mxu1 (!%p1844_p10), %v2165_v3 }
 0x371   : > { %1981 = vmatprep.mubr.msk.bf16.mxu0 %vm780_vm2, %v1092_v12  ;;  %v2162_v12 = vld [vmem:[%s2563_s6 + $0x10] sm:$0xff] (!%p1844_p10)  }
 0x372   : > { %v1977_v17 = vpop.f32.mrb[12].mxu1  ;;  %1982 = vmatmul.mubr.msk.bf16.vlgmr.msra.gmra.mrb[8].mxu0 %vm780_vm2, %v1093_v11  ;;  %2024 = vmatpush3.bf16.msra.mxu1 (!%p1844_p10), %v2165_v3  ;;  %v2167_v11 = vld [vmem:[%s2568_s11 + $0x18] sm:$0xff] (!%p1844_p10)  }
 0x373   : > { %v1053_v19 = vpop.f32.mrb[13].mxu1  ;;  %v1082_v23 = vmul.f32 %v2151_v18, %v1977_v17  ;;  %1990 = vmatpush3.bf16.msra.mxu0 (!%p1844_p10), %v2156_v54  ;;  %2025 = vmatprep.subr.bf16.mxu1 (!%p1844_p10), %v2166_v7  ;;  %v2163_v17 = vld [vmem:[%s2563_s6 + $0x18] sm:$0xff] (!%p1844_p10)   ;;  %v2168_v18 = vld [vmem:[%s2568_s11 + $0x20] sm:$0xff] (!%p1844_p10)  }
 0x374   : > { %v1978_v21 = vpop.f32.mrb[14].mxu1  ;;  %v1080_v26 = vmul.f32 %v2149_v13, %v1053_v19  ;;  %1991 = vmatprep.subr.bf16.mxu0 (!%p1844_p10), %v2157_v55  ;;  %v2169_v19 = vld [vmem:[%s2568_s11 + $0x28] sm:$0xff] (!%p1844_p10)  }
 0x375   : > { %v1083_v24 = vmul.f32 %v2153_v20, %v1978_v21  ;;  %v1056_v25 = vpop.f32.mrb[15].mxu1  ;;  %v1862_v20 = vld [vmem:[%s2566_s9] ss:$0 sm:$0xff] (!%p1844_p10) }
 0x376   : > { %v1081_v27 = vmul.f32 %v2155_v22, %v1056_v25  ;;  %2026 = vmatpush3.bf16.msra.mxu1 (!%p1844_p10), %v2166_v7 }
 0x377   : > { %v1095_v28 = vpack.c.bf16 %v1083_v24, %v1082_v23  ;;  %1992 = vmatpush3.bf16.msra.mxu0 (!%p1844_p10), %v2157_v55  ;;  %2027 = vmatprep.subr.bf16.mxu1 (!%p1844_p10), %v2167_v11  ;;  %v1863_v23 = vld [vmem:[%s2590_s16] ss:$0 sm:$0xff] (!%p1844_p10) }
 0x378   : > { %v1094_v29 = vpack.c.bf16 %v1081_v27, %v1080_v26  ;;  %1993 = vmatprep.subr.bf16.mxu0 (!%p1844_p10), %v2158_v56 }
 0x37a   : > { %1985 = vmatprep.mubr.msk.bf16.mxu0 %vm780_vm2, %v1094_v29  ;;  %2028 = vmatpush3.bf16.msra.mxu1 (!%p1844_p10), %v2167_v11 }
 0x37b   : > { %1986 = vmatmul.mubr.msk.bf16.gmra.mrb[12].mxu0 %vm780_vm2, %v1095_v28  ;;  %2029 = vmatprep.subr.bf16.mxu1 (!%p1844_p10), %v2168_v18 }
 0x37c   : > { %1994 = vmatpush3.bf16.msra.mxu0 (!%p1844_p10), %v2158_v56 }
 0x37d   : > { %1995 = vmatprep.subr.bf16.mxu0 (!%p1844_p10), %v2159_v60 }
 0x37e   : > { %2030 = vmatpush3.bf16.msra.mxu1 (!%p1844_p10), %v2168_v18 }
 0x37f   : > { %2031 = vmatprep.subr.bf16.mxu1 (!%p1844_p10), %v2169_v19 }
 0x380   : > { %1996 = vmatpush3.bf16.msra.mxu0 (!%p1844_p10), %v2159_v60 }
 0x381   : > { %2005 = vmatprep.subr.bf16.mxu0 (!%p1844_p10), %v2160_v63 }
 0x382   : > { %2032 = vmatpush3.bf16.msra.mxu1 (!%p1844_p10), %v2169_v19 }
 0x445   : > { %v1983_v32 = vpop.f32.mrb[8].mxu0 }
 0x446   : > { %v1183_v34 = vadd.f32 %v1983_v32, %v1086_v30  ;;  %v1150_v35 = vpop.f32.mrb[9].mxu0 }
 0x447   : > { %v1181_v37 = vadd.f32 %v1150_v35, %v1084_v31  ;;  %v1984_v38 = vpop.f32.mrb[10].mxu0 }
 0x448   : > { %1191 = vst.msk [vmem:[#allocation2 + $0x10] sm:$0xff] %vm690_vm1, %v1183_v34  ;;  %v1184_v39 = vadd.f32 %v1984_v38, %v1087_v33  ;;  %v1153_v40 = vpop.f32.mrb[11].mxu0 }
 0x449   : > { %1189 = vst.msk [vmem:[#allocation2] sm:$0xff] %vm690_vm1, %v1181_v37  ;;  %v1182_v41 = vadd.f32 %v1153_v40, %v1085_v36 }
 0x44a   : > { %1192 = vst.msk [vmem:[#allocation2 + $0x18] sm:$0xff] %vm690_vm1, %v1184_v39 }
 0x44b   : > { %1190 = vst.msk [vmem:[#allocation2 + $0x8] sm:$0xff] %vm690_vm1, %v1182_v41 }
 0x44e   : > { %v1987_v44 = vpop.f32.mrb[12].mxu0  ;;  %1200 = sbr.rel (%p1844_p10) target bundleno = 1579 (0x62b), region = 80 }
 0x44f   : > { %v1187_v46 = vadd.f32 %v1987_v44, %v1090_v42  ;;  %v1166_v47 = vpop.f32.mrb[13].mxu0  ;;  %v1203_v61 = vld [vmem:[#allocation2 + $0x10] sm:$0xff] (!%p1844_p10) }
 0x450   : > { %v1185_v49 = vadd.f32 %v1166_v47, %v1088_v43  ;;  %v1988_v50 = vpop.f32.mrb[14].mxu0  ;;  %v1201_v57 = vld [vmem:[#allocation2] sm:$0xff] (!%p1844_p10) }
 0x451   : > { %1195 = vst.msk [vmem:[#allocation2 + $0x30] sm:$0xff] %vm690_vm1, %v1187_v46  ;;  %v1188_v51 = vadd.f32 %v1988_v50, %v1091_v45  ;;  %v1169_v52 = vpop.f32.mrb[15].mxu0  ;;  %v1204_v62 = vld [vmem:[#allocation2 + $0x18] sm:$0xff] (!%p1844_p10) }
 0x452   : > { %1193 = vst.msk [vmem:[#allocation2 + $0x20] sm:$0xff] %vm690_vm1, %v1185_v49  ;;  %v1186_v53 = vadd.f32 %v1169_v52, %v1089_v48  ;;  %v1202_v58 = vld [vmem:[#allocation2 + $0x8] sm:$0xff] (!%p1844_p10)  ;;  %v1218_v4 = vpack.c.bf16 (!%p1844_p10), %v1204_v62, %v1203_v61 }
 0x453   : > { %1196 = vst.msk [vmem:[#allocation2 + $0x38] sm:$0xff] %vm690_vm1, %v1188_v51  ;;  %v1217_v59 = vpack.c.bf16 (!%p1844_p10), %v1202_v58, %v1201_v57 }
 0x454   : > { %1194 = vst.msk [vmem:[#allocation2 + $0x28] sm:$0xff] %vm690_vm1, %v1186_v53 }
 0x455   : > { %1997 = vmatprep.mubr.msk.bf16.mxu0 %vm690_vm1, %v1217_v59 }
 0x456   : > { %1998 = vmatmul.mubr.msk.bf16.vlgmr.msra.gmra.mrb[0].mxu0 %vm690_vm1, %v1218_v4 }
 0x457   : > { %2006 = vmatpush3.bf16.msra.mxu0 %v2160_v63 }
 0x458   : > { %v1207_v8 = vld [vmem:[#allocation2 + $0x30] sm:$0xff]  ;;  %2007 = vmatprep.subr.bf16.mxu0 %v2161_v5 }
 0x459   : > { %v1205_v0 = vld [vmem:[#allocation2 + $0x20] sm:$0xff] }
 0x45a   : > { %v1208_v9 = vld [vmem:[#allocation2 + $0x38] sm:$0xff] }
 0x45b   : > { %v1206_v1 = vld [vmem:[#allocation2 + $0x28] sm:$0xff]  ;;  %v1220_v13 = vpack.c.bf16 %v1208_v9, %v1207_v8  ;;  %2008 = vmatpush3.bf16.msra.mxu0 %v2161_v5 }
 0x45c   : > { %v1219_v6 = vpack.c.bf16 %v1206_v1, %v1205_v0  ;;  %2009 = vmatprep.subr.bf16.mxu0 %v2162_v12  ;;  %v1864_v1 = vld [vmem:[%s2592_s12] ss:$0 sm:$0xff] }
 0x45e   : > { %2001 = vmatprep.mubr.msk.bf16.mxu0 %vm690_vm1, %v1219_v6 }
 0x45f   : > { %2002 = vmatmul.mubr.msk.bf16.gmra.mrb[4].mxu0 %vm690_vm1, %v1220_v13 }
 0x460   : > { %2010 = vmatpush3.bf16.msra.mxu0 %v2162_v12  ;;  %2013 = vmatprep.mubr.msk.bf16.mxu0 %vm690_vm1, %v2382_v10  ;;  %v2170_v10 = vld [vmem:[%s2568_s11 + $0x30] sm:$0xff]  }
 0x461   : > { %2011 = vmatprep.subr.bf16.mxu0 %v2163_v17  ;;  %2033 = vmatprep.subr.bf16.mxu1 %v2170_v10 }
 0x462   : > { %2034 = vmatpush3.bf16.msra.mxu1 %v2170_v10 }
 0x464   : > { %2012 = vmatpush3.bf16.msra.mxu0 %v2163_v17 }
 0x467   : > { %2014 = vmatmul.mubr.msk.bf16.vlgmr.msra.gmra.mrb[0].mxu0 %vm690_vm1, %v2386_v14  ;;  %v2171_v14 = vld [vmem:[%s2568_s11 + $0x38] sm:$0xff]  }
 0x468   : > { %2017 = vmatprep.mubr.msk.bf16.mxu0 %vm690_vm1, %v2388_v15  ;;  %2035 = vmatprep.subr.bf16.mxu1 %v2171_v14  ;;  %v1861_v15 = vld [vmem:[%s2565_s8] ss:$0 sm:$0xff] }
 0x469   : > { %2036 = vmatpush3.bf16.msra.mxu1 %v2171_v14 }
 0x46f   : > { %2018 = vmatmul.mubr.msk.bf16.gmra.mrb[4].mxu0 %vm690_vm1, %v2394_v16 }
 0x53a   : > { %v2015_v16 = vpop.f32.mrb[0].mxu0 }
 0x53b   : > { %v1428_v21 = vadd.f32 %v2015_v16, %v1861_v15  ;;  %v1388_v22 = vpop.f32.mrb[1].mxu0 }
 0x53c   : > { %v1426_v24 = vadd.f32 %v1861_v15, %v1388_v22  ;;  %v2016_v25 = vpop.f32.mrb[2].mxu0 }
 0x53d   : > { %v1443_v26 = vmul.f32 %v1862_v20, %v1428_v21  ;;  %v1429_v27 = vadd.f32 %v2016_v25, %v1861_v15  ;;  %v1391_v28 = vpop.f32.mrb[3].mxu0 }
 0x53e   : > { %v1441_v29 = vmul.f32 %v1862_v20, %v1426_v24  ;;  %v1427_v30 = vadd.f32 %v1861_v15, %v1391_v28 }
 0x53f   : > { %v1458_v31 = vadd.f32 %v1863_v23, %v1443_v26  ;;  %v1444_v32 = vmul.f32 %v1862_v20, %v1429_v27 }
 0x540   : > { %v1442_v33 = vmul.f32 %v1862_v20, %v1427_v30  ;;  %v1456_v34 = vadd.f32 %v1863_v23, %v1441_v29 }
 0x541   : > { %v1459_v35 = vadd.f32 %v1863_v23, %v1444_v32  ;;  %v1466_v38 = vmax.f32 %v1458_v31, 0.0 }
 0x542   : > { %v2019_v36 = vpop.f32.mrb[4].mxu0  ;;  %v1457_v37 = vadd.f32 %v1863_v23, %v1442_v33  ;;  %v1464_v44 = vmax.f32 %v1456_v34, 0.0 }
 0x543   : > { %v1467_v39 = vmax.f32 %v1459_v35, 0.0  ;;  %v1432_v40 = vadd.f32 %v2019_v36, %v1861_v15  ;;  %v1404_v41 = vpop.f32.mrb[5].mxu0 }
 0x544   : > { %v1430_v42 = vadd.f32 %v1861_v15, %v1404_v41  ;;  %v2020_v43 = vpop.f32.mrb[6].mxu0  ;;  %v1465_v45 = vmax.f32 %v1457_v37, 0.0 }
 0x545   : > { %v1447_v46 = vmul.f32 %v1862_v20, %v1432_v40  ;;  %v1433_v47 = vadd.f32 %v2020_v43, %v1861_v15  ;;  %v1407_v48 = vpop.f32.mrb[7].mxu0  ;;  %v1473_v49 = vpack.c.bf16 %v1467_v39, %v1466_v38 }
 0x546   : > { %v1445_v50 = vmul.f32 %v1862_v20, %v1430_v42  ;;  %v1431_v51 = vadd.f32 %v1861_v15, %v1407_v48  ;;  %v1472_v52 = vpack.c.bf16 %v1465_v45, %v1464_v44 }
 0x547   : > { %v1462_v53 = vadd.f32 %v1863_v23, %v1447_v46  ;;  %v1448_v54 = vmul.f32 %v1862_v20, %v1433_v47 }
 0x548   : > { %v1460_v55 = vadd.f32 %v1863_v23, %v1445_v50  ;;  %v1446_v56 = vmul.f32 %v1862_v20, %v1431_v51  ;;  %2037 = vmatprep.mubr.bf16.mxu1 %v1472_v52 }
 0x549   : > { %v1463_v57 = vadd.f32 %v1863_v23, %v1448_v54  ;;  %2038 = vmatmul.mubr.bf16.vlgmr.msra.gmra.mrb[0].mxu1 %v1473_v49  ;;  %v1470_v59 = vmax.f32 %v1462_v53, 0.0 }
 0x54a   : > { %v1461_v58 = vadd.f32 %v1863_v23, %v1446_v56  ;;  %v1468_v61 = vmax.f32 %v1460_v55, 0.0 }
 0x54b   : > { %v1471_v60 = vmax.f32 %v1463_v57, 0.0 }
 0x54c   : > { %v1469_v62 = vmax.f32 %v1461_v58, 0.0 }
 0x54d   : > { %v1475_v63 = vpack.c.bf16 %v1471_v60, %v1470_v59 }
 0x54e   : > { %v1474_v0 = vpack.c.bf16 %v1469_v62, %v1468_v61 }
 0x550   : > { %2041 = vmatprep.mubr.bf16.mxu1 %v1474_v0 }
 0x551   : > { %2042 = vmatmul.mubr.bf16.gmra.mrb[4].mxu1 %v1475_v63 }
 0x61c   : > { %v2039_v2 = vpop.f32.mrb[0].mxu1 }
 0x61d   : > { %v1590_v3 = vadd.f32 %v2039_v2, %v1864_v1  ;;  %v1581_v4 = vpop.f32.mrb[1].mxu1 }
 0x61e   : > { %v1582_v5 = vadd.f32 %v1864_v1, %v1581_v4  ;;  %v2040_v6 = vpop.f32.mrb[2].mxu1 }
 0x61f   : > { %1614 = vst.msk [vmem:[%s2591_s17 + $0x10] sm:$0xff] %vm690_vm1, %v1590_v3  ;;  %v1593_v7 = vadd.f32 %v2040_v6, %v1864_v1  ;;  %v1584_v8 = vpop.f32.mrb[3].mxu1 }
 0x620   : > { %1612 = vst.msk [vmem:[%s2591_s17] sm:$0xff] %vm690_vm1, %v1582_v5  ;;  %v1585_v9 = vadd.f32 %v1864_v1, %v1584_v8 }
 0x621   : > { %1615 = vst.msk [vmem:[%s2591_s17 + $0x18] sm:$0xff] %vm690_vm1, %v1593_v7 }
 0x622   : > { %1613 = vst.msk [vmem:[%s2591_s17 + $0x8] sm:$0xff] %vm690_vm1, %v1585_v9 }
 0x624   : > { %v2043_v11 = vpop.f32.mrb[4].mxu1 }
 0x625   : > { %v1606_v12 = vadd.f32 %v2043_v11, %v1864_v1  ;;  %v1597_v13 = vpop.f32.mrb[5].mxu1 }
 0x626   : > { %v1598_v17 = vadd.f32 %v1864_v1, %v1597_v13  ;;  %v2044_v18 = vpop.f32.mrb[6].mxu1 }
 0x627   : > { %1618 = vst.msk [vmem:[%s2591_s17 + $0x30] sm:$0xff] %vm690_vm1, %v1606_v12  ;;  %v1609_v19 = vadd.f32 %v2044_v18, %v1864_v1  ;;  %v1600_v10 = vpop.f32.mrb[7].mxu1 }
 0x628   : > { %1616 = vst.msk [vmem:[%s2591_s17 + $0x20] sm:$0xff] %vm690_vm1, %v1598_v17  ;;  %v1601_v14 = vadd.f32 %v1864_v1, %v1600_v10 }
 0x629   : > { %1619 = vst.msk [vmem:[%s2591_s17 + $0x38] sm:$0xff] %vm690_vm1, %v1609_v19 }
 0x62a   : > { %1617 = vst.msk [vmem:[%s2591_s17 + $0x28] sm:$0xff] %vm690_vm1, %v1601_v14 }
 0x62b PF: > { %s2593_s13 = sld [smem:[#allocation6_spill]]  ;;  %s2594_s25 = sld [smem:[#allocation3_spill]] }
 0x62c   : > { %s2595_s26 = sld [smem:[#allocation4_spill]]  ;;  %s2596_s27 = sld [smem:[#allocation5_spill]] }
 0x62d   : > { %s2597_s28 = sld [smem:[#allocation7_spill]]  ;;  %s2598_s29 = sld [smem:[#allocation8_spill]] }
 0x62e   : > { %s2599_s30 = sld [smem:[#allocation9_spill]] }
 0x631   : > { %s23_s14 = sadd.s32 1, %s2593_s13  }
 0x632   : > { %p20_p11 = scmp.ge.s32.totalorder %s23_s14, 18  }
 0x634   :  { %22 = sbr.rel (!%p20_p11) target bundleno = 6 (0x6), region = 125 }

</bundles_post_ra>
